<compile_context>
chip_gen: v7x
topology: tpu7x:2x2x1
jax: 0.10.0
libtpu: 0.0.40
codegen_flags: <defaults>
</compile_context>

<pallas_src>
import jax
import jax.numpy as jnp
from jax.experimental import pallas as pl
from jax.experimental.pallas import tpu as pltpu


def _round_up(x, m):
    return (x + m - 1) // m * m


# ------------------------------------------------------------------ TPU config

def _tpu_config():
    """Generation-aware VMEM budget / tile size / bf16-exp flag."""
    try:
        cap = int(pltpu.get_tpu_info().vmem_capacity_bytes)
    except Exception:
        cap = 64 * 1024 * 1024                       # conservative (v7x-sized)
    try:
        kind = jax.devices()[0].device_kind.lower()
    except Exception:
        kind = ""
    vmem_limit = min(int(cap * 0.7), 112 * 1024 * 1024)
    big_tm = 256 if cap >= 96 * 1024 * 1024 else 128  # bigger stripes on 128-MiB chips
    use_bf16_exp = "v5" not in kind                   # v5 has no bf16 VPU/EUP
    return vmem_limit, big_tm, use_bf16_exp


def _pick_tm(n, big_tm):
    """Attention row tile: multiple of 32 (int8 adjacency tiling), >=2 grid steps
    when the graph is big enough (so both v7x TensorCores are used)."""
    if n <= 32:
        return 32
    tm = _round_up(_round_up(n, 64) // 2, 32)
    return min(tm, big_tm)


def _pick_tm_qkv(n_p):
    """QKV projection row tile: as large as layout rules allow (per-step work is tiny)."""
    if n_p <= 512:
        return n_p
    for cand in (512, 256, 128):
        if n_p % cand == 0:
            return cand
    return n_p  # defensive fallback: single full-extent step (always layout-legal)


# ------------------------------------------------------------------ kernels

def _qkv_kernel(h_ref, w_ref, b_ref, q_ref, kt_ref, v_ref):
    """Fused Q/K/V projection for one tile of rows: [TM, Din_p] @ [Din_p, 3*Dp] + bias.
    K is written transposed so the attention kernel does plain matmuls."""
    dp = q_ref.shape[1]
    x = jnp.dot(h_ref[...], w_ref[...], preferred_element_type=jnp.float32) + b_ref[...]
    q_ref[...] = x[:, :dp].astype(q_ref.dtype)
    kt_ref[...] = x[:, dp:2 * dp].T.astype(kt_ref.dtype)   # one XLU transpose per row tile
    v_ref[...] = x[:, 2 * dp:].astype(v_ref.dtype)


def _make_attn_kernel(num_heads, hd_p, exp_dtype):
    def _attn_kernel(a_ref, q_ref, kt_ref, v_ref, wo_ref, bo_ref, o_ref):
        # ---- mask work hoisted out of the per-head loop (once per row tile) ----
        a = a_ref[...].astype(jnp.float32)                # int8 {0,1} -> f32
        neg_bias = jnp.where(a > 0, 0.0, -1e30)           # [TM, N_p]
        # any neighbor on this row?  (max of neg_bias is 0 iff some edge exists)
        row_valid = jnp.max(neg_bias, axis=-1, keepdims=True) > -0.5   # [TM, 1]

        q = q_ref[...]            # [TM, Dp]   bf16
        kt = kt_ref[...]          # [Dp, N_p]  bf16 (resident across row tiles)
        v = v_ref[...]            # [N_p, Dp]  bf16 (resident)

        ctx_heads = []
        for hh in range(num_heads):                       # static unroll over heads
            lo = hh * hd_p
            # scores on the MXU (scaling already folded into Wq)
            s = jnp.dot(q[:, lo:lo + hd_p], kt[lo:lo + hd_p, :],
                        preferred_element_type=jnp.float32)        # [TM, N_p] f32
            s = s + neg_bias
            m = jnp.max(s, axis=-1, keepdims=True)
            # masked entries sit ~1e30 below m -> exp underflows to exactly 0;
            # fully masked (isolated / padded) rows are zeroed via row_valid below.
            p = jnp.exp((s - m).astype(exp_dtype))
            denom = jnp.sum(p, axis=-1, keepdims=True, dtype=jnp.float32)
            inv = jnp.where(row_valid, pl.reciprocal(denom, approx=True), 0.0)
            ctx_heads.append(
                jnp.dot(p.astype(v.dtype), v[:, lo:lo + hd_p],
                        preferred_element_type=jnp.float32) * inv)   # [TM, hd_p]

        ctx = jnp.concatenate(ctx_heads, axis=1)          # [TM, Dp] lane-blocked
        # single K=Dp output projection (replaces 8 shallow K=hd_p matmuls)
        o_ref[...] = jnp.dot(ctx, wo_ref[...],
                             preferred_element_type=jnp.float32) + bo_ref[...]
    return _attn_kernel


# ------------------------------------------------------------------ pallas_call wrappers

def _qkv_projection(h_p, wqkv, bqkv, dp, tm, vmem_limit):
    n_p, din_p = h_p.shape
    return pl.pallas_call(
        _qkv_kernel,
        out_shape=(jax.ShapeDtypeStruct((n_p, dp), jnp.bfloat16),
                   jax.ShapeDtypeStruct((dp, n_p), jnp.bfloat16),   # K^T
                   jax.ShapeDtypeStruct((n_p, dp), jnp.bfloat16)),
        grid=(n_p // tm,),
        in_specs=[
            pl.BlockSpec((tm, din_p), lambda i: (i, 0)),
            pl.BlockSpec((din_p, wqkv.shape[1]), lambda i: (0, 0)),
            pl.BlockSpec((1, bqkv.shape[1]), lambda i: (0, 0)),
        ],
        out_specs=(
            pl.BlockSpec((tm, dp), lambda i: (i, 0)),
            pl.BlockSpec((dp, tm), lambda i: (0, i)),
            pl.BlockSpec((tm, dp), lambda i: (i, 0)),
        ),
        compiler_params=pltpu.CompilerParams(
            dimension_semantics=("parallel",),
            vmem_limit_bytes=vmem_limit),
    )(h_p, wqkv, bqkv)


def _attention(a_p, q_p, kt_p, v_p, wo_p, bo_p, num_heads, hd_p, tm,
               vmem_limit, use_bf16_exp):
    n_p = a_p.shape[0]
    dp = q_p.shape[1]
    do_p = wo_p.shape[1]
    kernel = _make_attn_kernel(num_heads, hd_p,
                               jnp.bfloat16 if use_bf16_exp else jnp.float32)
    return pl.pallas_call(
        kernel,
        out_shape=jax.ShapeDtypeStruct((n_p, do_p), jnp.float32),
        grid=(n_p // tm,),
        in_specs=[
            pl.BlockSpec((tm, n_p), lambda i: (i, 0)),   # int8 adjacency row stripe (pipelined)
            pl.BlockSpec((tm, dp), lambda i: (i, 0)),    # q tile
            pl.BlockSpec((dp, n_p), lambda i: (0, 0)),   # K^T resident in VMEM
            pl.BlockSpec((n_p, dp), lambda i: (0, 0)),   # V resident in VMEM
            pl.BlockSpec((dp, do_p), lambda i: (0, 0)),  # Wo resident
            pl.BlockSpec((1, do_p), lambda i: (0, 0)),   # bo
        ],
        out_specs=pl.BlockSpec((tm, do_p), lambda i: (i, 0)),
        compiler_params=pltpu.CompilerParams(
            dimension_semantics=("parallel",),
            vmem_limit_bytes=vmem_limit),
    )(a_p, q_p, kt_p, v_p, wo_p, bo_p)


# ------------------------------------------------------------------ layout plumbing (wrapper)

def _prep_qkv_weight(w, b, num_heads, hd, hd_p, din_p, scale=1.0):
    """Permute columns so heads are contiguous blocks of width hd_p, zero-pad lane-dense."""
    din, _ = w.shape
    wp = w.reshape(din, hd, num_heads).transpose(0, 2, 1)                # [Din, H, hd]
    wp = jnp.pad(wp, ((0, din_p - din), (0, 0), (0, hd_p - hd)))
    wp = wp.reshape(din_p, num_heads * hd_p) * scale
    bp = jnp.pad(b.reshape(hd, num_heads).T, ((0, 0), (0, hd_p - hd)))
    bp = bp.reshape(1, num_heads * hd_p) * scale
    return wp, bp


def _prep_out_weight(w, b, num_heads, hd, hd_p, do_p):
    din, dout = w.shape                                                  # din == hd*H
    wp = w.reshape(hd, num_heads, dout).transpose(1, 0, 2)               # [H, hd, Dout]
    wp = jnp.pad(wp, ((0, 0), (0, hd_p - hd), (0, do_p - dout)))
    wp = wp.reshape(num_heads * hd_p, do_p)
    bp = jnp.pad(b.reshape(1, dout), ((0, 0), (0, do_p - dout)))
    return wp, bp


def sparse_mha_forward(adj, h, params, num_heads):
    """Forward pass of SparseMHA. adj: dense 0/1 adjacency mask [N, N]; h: [N, hidden]."""
    wq, bq, wk, bk, wv, bv, wo, bo = params
    n, d = h.shape
    hd = d // num_heads
    scaling = float(hd) ** (-0.5)

    vmem_limit, big_tm, use_bf16_exp = _tpu_config()

    hd_p = _round_up(hd, 16)                # per-head padded width (10 -> 16)
    dp = num_heads * hd_p                   # head-blocked padded hidden (80 -> 128)
    din_p = _round_up(d, 128)               # lane-dense projection contraction
    do_p = _round_up(d, 128)                # lane-dense output projection

    tm = _pick_tm(n, big_tm)
    n_p = _round_up(n, tm)
    tm_qkv = _pick_tm_qkv(n_p)

    # one-time weight permutation / padding (layout plumbing, not compute)
    wq_p, bq_p = _prep_qkv_weight(wq, bq, num_heads, hd, hd_p, din_p, scale=scaling)
    wk_p, bk_p = _prep_qkv_weight(wk, bk, num_heads, hd, hd_p, din_p)
    wv_p, bv_p = _prep_qkv_weight(wv, bv, num_heads, hd, hd_p, din_p)
    wqkv = jnp.concatenate([wq_p, wk_p, wv_p], axis=1).astype(jnp.bfloat16)  # [Din_p, 3*Dp]
    bqkv = jnp.concatenate([bq_p, bk_p, bv_p], axis=1).astype(jnp.float32)   # [1, 3*Dp]
    wo_p, bo_p = _prep_out_weight(wo, bo, num_heads, hd, hd_p, do_p)
    wo_p = wo_p.astype(jnp.float32)
    bo_p = bo_p.astype(jnp.float32)

    # bf16 for features / Q,K,V; int8 for the adjacency (it only feeds a ">0" mask,
    # and the N x N stream dominates HBM bytes). f32 accumulation in-kernel.
    h_p = jnp.pad(h, ((0, n_p - n), (0, din_p - d))).astype(jnp.bfloat16)
    a_p = (jnp.pad(adj, ((0, n_p - n), (0, n_p - n))) > 0).astype(jnp.int8)

    q_p, kt_p, v_p = _qkv_projection(h_p, wqkv, bqkv, dp, tm_qkv, vmem_limit)
    out_p = _attention(a_p, q_p, kt_p, v_p, wo_p, bo_p,
                       num_heads, hd_p, tm, vmem_limit, use_bf16_exp)
    return out_p[:n, :d]


# ------------------------------------------------------------------ reference & init

def ref_sparse_mha(adj, h, params, num_heads):
    """Pure-JAX reference mirroring the PyTorch forward (dense-masked sparse attention)."""
    wq, bq, wk, bk, wv, bv, wo, bo = params
    n, d = h.shape
    hd = d // num_heads
    scaling = float(hd) ** (-0.5)
    q = (h @ wq + bq).reshape(n, hd, num_heads) * scaling
    k = (h @ wk + bk).reshape(n, hd, num_heads)
    v = (h @ wv + bv).reshape(n, hd, num_heads)
    s = jnp.einsum('idh,jdh->ijh', q, k)
    mask = (adj > 0)[:, :, None]
    s = jnp.where(mask, s, -1e30)
    m = jnp.max(s, axis=1, keepdims=True)
    p = jnp.where(mask, jnp.exp(s - m), 0.0)
    denom = jnp.sum(p, axis=1, keepdims=True)
    p = p * jnp.where(denom > 0, 1.0 / denom, 0.0)
    out = jnp.einsum('ijh,jdh->idh', p, v).reshape(n, d)
    return out @ wo + bo


def init_params(key, hidden_size):
    """nn.Linear-style init: uniform(-1/sqrt(fan_in), 1/sqrt(fan_in)) for weights and biases."""
    ks = jax.random.split(key, 8)
    bound = 1.0 / (hidden_size ** 0.5)

    def lin(kw, kb):
        w = jax.random.uniform(kw, (hidden_size, hidden_size), jnp.float32, -bound, bound)
        b = jax.random.uniform(kb, (hidden_size,), jnp.float32, -bound, bound)
        return w, b

    wq, bq = lin(ks[0], ks[1])
    wk, bk = lin(ks[2], ks[3])
    wv, bv = lin(ks[4], ks[5])
    wo, bo = lin(ks[6], ks[7])
    return (wq, bq, wk, bk, wv, bv, wo, bo)


if __name__ == "__main__":
    # Small shapes consistent with the module defaults: hidden_size=80, num_heads=8.
    num_nodes = 16
    hidden_size = 80
    num_heads = 8

    key = jax.random.PRNGKey(0)
    k_graph, k_feat, k_param = jax.random.split(key, 3)

    # dense 0/1 adjacency of the sparse graph; self-loops keep every row non-empty
    adj = (jax.random.uniform(k_graph, (num_nodes, num_nodes)) < 0.4).astype(jnp.float32)
    adj = jnp.maximum(adj, jnp.eye(num_nodes, dtype=jnp.float32))
    h = jax.random.normal(k_feat, (num_nodes, hidden_size), dtype=jnp.float32)
    params = init_params(k_param, hidden_size)

    out = sparse_mha_forward(adj, h, params, num_heads)
    out = jax.block_until_ready(out)

    assert out.shape == (num_nodes, hidden_size)
    assert out.dtype == jnp.float32

    ref = ref_sparse_mha(adj, h, params, num_heads)
    max_err = float(jnp.max(jnp.abs(out - ref)))
    assert max_err < 5e-2, f"mismatch vs reference: max abs err = {max_err}"

    print("KERNEL_OK")
</pallas_src>

<mosaic_0001>
module attributes {stable_mosaic.version = 11 : i64} {
  func.func @_qkv_kernel(%arg0: i32, %arg1: memref<32x128xbf16, #tpu.memory_space<vmem>>, %arg2: memref<128x384xbf16, #tpu.memory_space<vmem>>, %arg3: memref<1x384xf32, #tpu.memory_space<vmem>>, %arg4: memref<32x128xbf16, #tpu.memory_space<vmem>>, %arg5: memref<128x32xbf16, #tpu.memory_space<vmem>>, %arg6: memref<32x128xbf16, #tpu.memory_space<vmem>>) attributes {dimension_semantics = [#tpu.dimension_semantics<parallel>], iteration_bounds = array<i64: 1>, scalar_prefetch = 0 : i64, scratch_operands = 0 : i64, tpu.core_type = #tpu.core_type<tc>, window_params = [{transform_indices = @transform_0, window_bounds = array<i64: 32, 128>}, {pipeline_mode = #tpu.pipeline_mode<synchronous>, transform_indices = @transform_1, window_bounds = array<i64: 128, 384>}, {pipeline_mode = #tpu.pipeline_mode<synchronous>, transform_indices = @transform_2, window_bounds = array<i64: 1, 384>}, {transform_indices = @transform_3, window_bounds = array<i64: 32, 128>}, {transform_indices = @transform_4, window_bounds = array<i64: 128, 32>}, {transform_indices = @transform_5, window_bounds = array<i64: 32, 128>}]} {
    %c0 = arith.constant 0 : index
    %c0_0 = arith.constant 0 : index
    %0 = vector.load %arg1[%c0, %c0_0] : memref<32x128xbf16, #tpu.memory_space<vmem>>, vector<32x128xbf16>
    %c0_1 = arith.constant 0 : index
    %c0_2 = arith.constant 0 : index
    %1 = vector.load %arg2[%c0_1, %c0_2] : memref<128x384xbf16, #tpu.memory_space<vmem>>, vector<128x384xbf16>
    %cst = arith.constant dense<0.000000e+00> : vector<32x384xf32>
    %2 = tpu.matmul %0, %1, %cst {dimension_numbers = #tpu.dot_dimension_numbers<[1], [0], [0], [1], [0, 0, 1, 1], [], []>} : vector<32x128xbf16>, vector<128x384xbf16>, vector<32x384xf32> -> vector<32x384xf32>
    %c0_3 = arith.constant 0 : index
    %c0_4 = arith.constant 0 : index
    %3 = vector.load %arg3[%c0_3, %c0_4] : memref<1x384xf32, #tpu.memory_space<vmem>>, vector<1x384xf32>
    %4 = vector.broadcast %3 : vector<1x384xf32> to vector<32x384xf32>
    %5 = arith.addf %2, %4 : vector<32x384xf32>
    %6 = vector.extract_strided_slice %5 {offsets = [0, 0], sizes = [32, 128], strides = [1, 1]} : vector<32x384xf32> to vector<32x128xf32>
    %7 = arith.truncf %6 : vector<32x128xf32> to vector<32x128xbf16>
    %c0_5 = arith.constant 0 : index
    %c0_6 = arith.constant 0 : index
    %8 = vector.load %arg4[%c0_5, %c0_6] : memref<32x128xbf16, #tpu.memory_space<vmem>>, vector<32x128xbf16>
    tpu.vector_store %arg4[%c0_5, %c0_6], %7 {strides = array<i32>} : memref<32x128xbf16, #tpu.memory_space<vmem>>, vector<32x128xbf16>,
    %9 = vector.extract_strided_slice %5 {offsets = [0, 128], sizes = [32, 128], strides = [1, 1]} : vector<32x384xf32> to vector<32x128xf32>
    %10 = tpu.transpose %9, [1, 0] : vector<32x128xf32> -> vector<128x32xf32>
    %11 = arith.truncf %10 : vector<128x32xf32> to vector<128x32xbf16>
    %c0_7 = arith.constant 0 : index
    %c0_8 = arith.constant 0 : index
    %12 = vector.load %arg5[%c0_7, %c0_8] : memref<128x32xbf16, #tpu.memory_space<vmem>>, vector<128x32xbf16>
    tpu.vector_store %arg5[%c0_7, %c0_8], %11 {strides = array<i32>} : memref<128x32xbf16, #tpu.memory_space<vmem>>, vector<128x32xbf16>,
    %13 = vector.extract_strided_slice %5 {offsets = [0, 256], sizes = [32, 128], strides = [1, 1]} : vector<32x384xf32> to vector<32x128xf32>
    %14 = arith.truncf %13 : vector<32x128xf32> to vector<32x128xbf16>
    %c0_9 = arith.constant 0 : index
    %c0_10 = arith.constant 0 : index
    %15 = vector.load %arg6[%c0_9, %c0_10] : memref<32x128xbf16, #tpu.memory_space<vmem>>, vector<32x128xbf16>
    tpu.vector_store %arg6[%c0_9, %c0_10], %14 {strides = array<i32>} : memref<32x128xbf16, #tpu.memory_space<vmem>>, vector<32x128xbf16>,
    return
  }
  func.func @transform_0(%arg0: i32) -> (i32, i32) {
    %c0_i32 = arith.constant 0 : i32
    %c0_i32_0 = arith.constant 0 : i32
    return %arg0, %c0_i32 : i32, i32
  }
  func.func @transform_1(%arg0: i32) -> (i32, i32) {
    %c0_i32 = arith.constant 0 : i32
    %c0_i32_0 = arith.constant 0 : i32
    %c0_i32_1 = arith.constant 0 : i32
    return %c0_i32, %c0_i32_0 : i32, i32
  }
  func.func @transform_2(%arg0: i32) -> (i32, i32) {
    %c0_i32 = arith.constant 0 : i32
    %c0_i32_0 = arith.constant 0 : i32
    %c0_i32_1 = arith.constant 0 : i32
    return %c0_i32, %c0_i32_0 : i32, i32
  }
  func.func @transform_3(%arg0: i32) -> (i32, i32) {
    %c0_i32 = arith.constant 0 : i32
    %c0_i32_0 = arith.constant 0 : i32
    return %arg0, %c0_i32 : i32, i32
  }
  func.func @transform_4(%arg0: i32) -> (i32, i32) {
    %c0_i32 = arith.constant 0 : i32
    %c0_i32_0 = arith.constant 0 : i32
    return %c0_i32, %arg0 : i32, i32
  }
  func.func @transform_5(%arg0: i32) -> (i32, i32) {
    %c0_i32 = arith.constant 0 : i32
    %c0_i32_0 = arith.constant 0 : i32
    return %arg0, %c0_i32 : i32, i32
  }
}

</mosaic_0001>

<bundles_post_ra>
// kernel: tpu_custom_call.1
= control target key start
LH: loop header
LB: loop body
LE: loop exit
PB: predicated region body
PF: predicated region fallthrough
CT: control target
= control target key end

     0   :  { %11 = vsyncpa [#allocation3], 0  ;;  %s970_s0 = inlined_call_operand.hbm [shape: bf16[32,128], index: 0, kind: input, shape index: {}]   ;;  %s971_s1 = inlined_call_operand.hbm [shape: bf16[128,384], index: 1, kind: input, shape index: {}]   ;;  %s972_s2 = inlined_call_operand.vmem [shape: f32[1,384], index: 2, kind: input, shape index: {}]   ;;  %s973_s3 = inlined_call_operand.hbm [shape: bf16[32,128], index: 3, kind: output, shape index: {0}]   ;;  %s974_s4 = inlined_call_operand.vmem [shape: bf16[128,32], index: 4, kind: output, shape index: {1}]   ;;  %s975_s5 = inlined_call_operand.hbm [shape: bf16[32,128], index: 5, kind: output, shape index: {2}]  }
   0x1   :  { %12 = vsyncpa [#allocation6], 0 }
   0x2   :  { %13 = vsyncpa [#allocation4], 0 }
   0x3   :  { %14 = vsyncpa [#allocation9], 0  ;;  %s800_s18 = smov [#allocation2]   ;;  %s704_s22 = scalar_lea.hbm %s970_s0, 256 }
   0x4   :  { %s20_s19 = sshll.u32 %s800_s18, 4  ;;  %p705_p0 = scmp.ne.s32.totalorder %s970_s0, %s704_s22  ;;  %s21_s19 = int_to_ptr.vmem [resolvable:$true] %s20_s19 }
   0x5   :  { %p708_p1 = scmp.lt.u32.totalorder %s704_s22, %s970_s0 }
   0x7   :  { %p710_p2 = pnand %p708_p1, %p705_p0 }
   0x9   :  { %713 = shalt.err (!%p710_p2)
}
   0xa   :  { %s714_s27 = scalar_lea.vmem %s21_s19, 256  ;;  %p719_p4 = scmp.lt.s32.totalorder %s21_s19, %s21_s19 }
   0xb   :  { %p715_p3 = scmp.ne.s32.totalorder %s21_s19, %s714_s27  ;;  %p720_p5 = scmp.lt.s32.totalorder %s714_s27, %s714_s27 }
   0xd   :  { %p721_p6 = por %p720_p5, %p719_p4 }
   0xf   :  { %p722_p7 = pnand %p721_p6, %p715_p3 }
  0x11   :  { %725 = shalt.err (!%p722_p7)
}
  0x12   :  { %s801_s28 = smov 64   ;;  %s802_s29 = smov 4  }
  0x13   :  { %26 = dma.hbm_to_vmem [thread:$0]  %s970_s0, 256, %s21_s19, [#allocation3], %s801_s28, %s801_s28, %s802_s29  }
  0x14   :  { %s803_s7 = smov [#allocation5]   ;;  %s726_s11 = scalar_lea.hbm %s971_s1, 3072 }
  0x15   :  { %s32_s8 = sshll.u32 %s803_s7, 4  ;;  %p727_p8 = scmp.ne.s32.totalorder %s971_s1, %s726_s11  ;;  %s33_s8 = int_to_ptr.vmem [resolvable:$true] %s32_s8 }
  0x16   :  { %p730_p9 = scmp.lt.u32.totalorder %s726_s11, %s971_s1 }
  0x18   :  { %p732_p10 = pnand %p730_p9, %p727_p8 }
  0x1a   :  { %735 = shalt.err (!%p732_p10)
}
  0x1b   :  { %s736_s16 = scalar_lea.vmem %s33_s8, 3072  ;;  %p741_p12 = scmp.lt.s32.totalorder %s33_s8, %s33_s8 }
  0x1c   :  { %p737_p11 = scmp.ne.s32.totalorder %s33_s8, %s736_s16  ;;  %p742_p13 = scmp.lt.s32.totalorder %s736_s16, %s736_s16 }
  0x1e   :  { %p743_p0 = por %p742_p13, %p741_p12 }
  0x20   :  { %p744_p1 = pnand %p743_p0, %p737_p11 }
  0x22   :  { %747 = shalt.err (!%p744_p1)
}
  0x23   :  { %s804_s0 = smov 192   ;;  %s805_s17 = smov 12  }
  0x24   :  { %38 = dma.hbm_to_vmem [thread:$0]  %s971_s1, 3072, %s33_s8, [#allocation6], %s804_s0, %s804_s0, %s805_s17  }
  0x25   :  { %792 = dma.done.wait [#allocation3], 256  }
  0x26   :  { %793 = vsyncadd [#allocation3], 4294967040 }
  0x27   :  { %794 = dma.done.wait [#allocation6], 3072  }
  0x28   :  { %795 = vsyncadd [#allocation6], 4294964224  ;;  %v806_v0 = vmov 0   ;;  %v670_v1 = vld [vmem:[#allocation5 + $0x4] ss:$12 sps:$4 sm:$0xff]   ;;  %v695_v26 = vld [vmem:[#allocation2 + $0x8] sm:$0xff]   ;;  %v86_v27 = vlaneseq }
  0x29   :  { %273 = vmatprep.mubr.bf16.mxu0 %v806_v0  ;;  %v672_v2 = vld [vmem:[#allocation5] ss:$12 sps:$4 sm:$0xff]   ;;  %241 = vmatprep.subr.bf16.mxu0 %v670_v1  ;;  %v673_v3 = vld [vmem:[#allocation5 + $0x1c] ss:$12 sps:$4 sm:$0xff]   ;;  %v675_v4 = vld [vmem:[#allocation5 + $0x18] ss:$12 sps:$4 sm:$0xff]  }
  0x2a   :  { %242 = vmatpush1.bf16.msra.mxu0 %v672_v2  ;;  %v676_v5 = vld [vmem:[#allocation5 + $0x34] ss:$12 sps:$4 sm:$0xff]   ;;  %v678_v6 = vld [vmem:[#allocation5 + $0x30] ss:$12 sps:$4 sm:$0xff]   ;;  %v679_v7 = vld [vmem:[#allocation5 + $0x4c] ss:$12 sps:$4 sm:$0xff]  }
  0x2b   :  { %243 = vmatprep.subr.bf16.mxu0 %v673_v3  ;;  %v681_v8 = vld [vmem:[#allocation5 + $0x48] ss:$12 sps:$4 sm:$0xff]   ;;  %v682_v10 = vld [vmem:[#allocation5 + $0x64] ss:$12 sps:$4 sm:$0xff]   ;;  %v697_v12 = vld [vmem:[#allocation5 + $0x20] ss:$12 sps:$4 sm:$0xff]  }
  0x2c   :  { %v694_v9 = vld [vmem:[#allocation2] sm:$0xff]   ;;  %v684_v13 = vld [vmem:[#allocation5 + $0x60] ss:$12 sps:$4 sm:$0xff]   ;;  %v685_v14 = vld [vmem:[#allocation5 + $0x7c] ss:$12 sps:$4 sm:$0xff]   ;;  %v87_v28 = vshrl.u32 %v86_v27, 7 }
  0x2d   :  { %v696_v11 = vld [vmem:[#allocation5 + $0x8] ss:$12 sps:$4 sm:$0xff]   ;;  %656 = vmatprep.mubr.bf16.mxu1 %v694_v9  ;;  %v698_v15 = vld [vmem:[#allocation5 + $0x38] ss:$12 sps:$4 sm:$0xff]   ;;  %v699_v18 = vld [vmem:[#allocation5 + $0x50] ss:$12 sps:$4 sm:$0xff]  }
  0x2e   :  { %244 = vmatpush1.bf16.msra.mxu0 %v675_v4  ;;  %640 = vmatprep.subr.bf16.mxu1 %v696_v11  ;;  %v687_v16 = vld [vmem:[#allocation5 + $0x78] ss:$12 sps:$4 sm:$0xff]   ;;  %v688_v17 = vld [vmem:[#allocation5 + $0x94] ss:$12 sps:$4 sm:$0xff]   ;;  %v690_v19 = vld [vmem:[#allocation5 + $0x90] ss:$12 sps:$4 sm:$0xff]  }
  0x2f   :  { %245 = vmatprep.subr.bf16.mxu0 %v676_v5  ;;  %641 = vmatpush3.bf16.msra.mxu1 %v696_v11  ;;  %v691_v20 = vld [vmem:[#allocation5 + $0xac] ss:$12 sps:$4 sm:$0xff]   ;;  %v700_v21 = vld [vmem:[#allocation5 + $0x68] ss:$12 sps:$4 sm:$0xff]   ;;  %v703_v25 = vld [vmem:[#allocation5 + $0xb0] ss:$12 sps:$4 sm:$0xff]  }
  0x30   :  { %642 = vmatprep.subr.bf16.mxu1 %v697_v12  ;;  %v693_v22 = vld [vmem:[#allocation5 + $0xa8] ss:$12 sps:$4 sm:$0xff]   ;;  %v701_v23 = vld [vmem:[#allocation5 + $0x80] ss:$12 sps:$4 sm:$0xff]   ;;  %v702_v24 = vld [vmem:[#allocation5 + $0x98] ss:$12 sps:$4 sm:$0xff]  }
  0x31   :  { %v92_v29 = vsub.s32 1, %v87_v28  ;;  %v84_v30 = vld [vmem:[%s972_s2] sm:$0x7]  ;;  %v88_v31 = vsub.s32 0, %v87_v28  ;;  %v96_v52 = vsub.s32 2, %v87_v28  ;;  %s807_s2 = smov [#allocation7]  }
  0x32   :  { %246 = vmatpush1.bf16.msra.mxu0 %v678_v6  ;;  %s501_s21 = sshll.u32 %s807_s2, 4  ;;  %s808_s22 = smov [#allocation8]   ;;  %s502_s21 = int_to_ptr.vmem [resolvable:$true] %s501_s21 }
  0x33   :  { %247 = vmatprep.subr.bf16.mxu0 %v679_v7  ;;  %643 = vmatpush3.bf16.msra.mxu1 %v697_v12  ;;  %v93_v32 = vrot.slane %v84_v30, %v92_v29  ;;  %v89_v33 = vrot.slane %v84_v30, %v88_v31  ;;  %v97_v55 = vrot.slane %v84_v30, %v96_v52  ;;  %s515_s23 = sshll.u32 %s808_s22, 4  ;;  %s748_s24 = scalar_lea.vmem %s502_s21, 256  ;;  %s869_s23 = int_to_ptr.vmem [resolvable:$true] %s515_s23 }
  0x34   :  { %644 = vmatprep.subr.bf16.mxu1 %v698_v15  ;;  %p749_p2 = scmp.ne.s32.totalorder %s502_s21, %s748_s24  ;;  %p753_p3 = scmp.lt.s32.totalorder %s502_s21, %s502_s21 }
  0x35   :  { %p754_p4 = scmp.lt.s32.totalorder %s748_s24, %s748_s24 }
  0x36   :  { %248 = vmatpush1.bf16.msra.mxu0 %v681_v8 }
  0x37   :  { %249 = vmatprep.subr.bf16.mxu0 %v682_v10  ;;  %645 = vmatpush3.bf16.msra.mxu1 %v698_v15  ;;  %p755_p5 = por %p754_p4, %p753_p3 }
  0x38   :  { %646 = vmatprep.subr.bf16.mxu1 %v699_v18 }
  0x39   :  { %p756_p6 = pnand %p755_p5, %p749_p2 }
  0x3a   :  { %250 = vmatpush1.bf16.msra.mxu0 %v684_v13 }
  0x3b   :  { %251 = vmatprep.subr.bf16.mxu0 %v685_v14  ;;  %647 = vmatpush3.bf16.msra.mxu1 %v699_v18 }
  0x3c   :  { %648 = vmatprep.subr.bf16.mxu1 %v700_v21 }
  0x3e   :  { %252 = vmatpush1.bf16.msra.mxu0 %v687_v16 }
  0x3f   :  { %253 = vmatprep.subr.bf16.mxu0 %v688_v17  ;;  %649 = vmatpush3.bf16.msra.mxu1 %v700_v21 }
  0x40   :  { %650 = vmatprep.subr.bf16.mxu1 %v701_v23 }
  0x42   :  { %254 = vmatpush1.bf16.msra.mxu0 %v690_v19 }
  0x43   :  { %255 = vmatprep.subr.bf16.mxu0 %v691_v20  ;;  %651 = vmatpush3.bf16.msra.mxu1 %v701_v23 }
  0x44   :  { %652 = vmatprep.subr.bf16.mxu1 %v702_v24 }
  0x46   :  { %256 = vmatpush1.bf16.msra.mxu0 %v693_v22 }
  0x47   :  { %653 = vmatpush3.bf16.msra.mxu1 %v702_v24 }
  0x48   :  { %654 = vmatprep.subr.bf16.mxu1 %v703_v25 }
  0x49   :  { %274 = vmatmul.mubr.bf16.vlgmr.msra.gmra.mrb[0].mxu0 %v694_v9 }
  0x4a   :  { %283 = vmatprep.mubr.bf16.mxu0 %v806_v0 }
  0x4b   :  { %655 = vmatpush3.bf16.msra.mxu1 %v703_v25 }
  0x4e   :  { %657 = vmatmul.mubr.bf16.vlgmr.msra.gmra.mrb[0].mxu1 %v695_v26 }
  0x51   :  { %284 = vmatmul.mubr.bf16.gmra.mrb[4].mxu0 %v695_v26 }
 0x11c   :  { %v275_v34 = vpop.f32.mrb[0].mxu0 }
 0x11d   :  { %v277_v35 = vpop.f32.mrb[1].mxu0  ;;  %v276_v38 = vadd.f32 %v275_v34, %v89_v33 }
 0x11e   :  { %v279_v36 = vpop.f32.mrb[2].mxu0  ;;  %v278_v37 = vadd.f32 %v277_v35, %v93_v32 }
 0x11f   :  { %v280_v39 = vadd.f32 %v279_v36, %v89_v33  ;;  %v281_v40 = vpop.f32.mrb[3].mxu0 }
 0x120   :  { %363 = vxpose.xlu0.b32.start [1/4] (short) %v278_v37, 128  ;;  %v282_v42 = vadd.f32 %v281_v40, %v93_v32 }
 0x121   :  { %v611_v41 = vpack.c.bf16 %v280_v39, %v276_v38  ;;  %v658_v53 = vpop.f32.mrb[0].mxu1 }
 0x122   :  { %v328_v54 = vpop.f32.mrb[1].mxu1  ;;  %v337_v58 = vadd.f32 %v658_v53, %v97_v55 }
 0x123   :  { %612 = vst [vmem:[#allocation7] sm:$0xff] %v611_v41   ;;  %v659_v56 = vpop.f32.mrb[2].mxu1  ;;  %v329_v59 = vadd.f32 %v328_v54, %v97_v55 }
 0x124   :  { %v285_v43 = vpop.f32.mrb[4].mxu0  ;;  %364 = vxpose.xlu0.b32.cont [2/4] (short) %v282_v42, 128  ;;  %v331_v57 = vpop.f32.mrb[3].mxu1  ;;  %v340_v60 = vadd.f32 %v659_v56, %v97_v55 }
 0x125   :  { %v287_v44 = vpop.f32.mrb[5].mxu0  ;;  %v286_v47 = vadd.f32 %v285_v43, %v89_v33  ;;  %v332_v61 = vadd.f32 %v331_v57, %v97_v55 }
 0x126   :  { %v288_v45 = vadd.f32 %v287_v44, %v93_v32  ;;  %v289_v46 = vpop.f32.mrb[6].mxu0  ;;  %v626_v62 = vpack.c.bf16 %v340_v60, %v337_v58 }
 0x127   :  { %v290_v48 = vadd.f32 %v289_v46, %v89_v33  ;;  %v291_v49 = vpop.f32.mrb[7].mxu0  ;;  %v621_v63 = vpack.c.bf16 %v332_v61, %v329_v59 }
 0x128   :  { %365 = vxpose.xlu0.b32.cont [3/4] (short) %v288_v45, 128  ;;  %v292_v51 = vadd.f32 %v291_v49, %v93_v32  ;;  %629 = vst [vmem:[#allocation8 + $0x8] sm:$0xff] %v626_v62  }
 0x129   :  { %v616_v50 = vpack.c.bf16 %v290_v48, %v286_v47  ;;  %622 = vst [vmem:[#allocation8] sm:$0xff] %v621_v63  }
 0x12b   :  { %628 = vst [vmem:[#allocation7 + $0x8] sm:$0xff] %v616_v50  }
 0x12c   :  { %366 = vxpose.xlu0.b32.end [4/4] (short) %v292_v51, 128 }
 0x12d   :  { %759 = shalt.err (!%p756_p6)
}
 0x12e   :  { %s760_s27 = scalar_lea.hbm %s973_s3, 256 }
 0x12f   :  { %p761_p7 = scmp.ne.s32.totalorder %s973_s3, %s760_s27  ;;  %p764_p8 = scmp.lt.u32.totalorder %s760_s27, %s973_s3 }
 0x131   :  { %p766_p9 = pnand %p764_p8, %p761_p7 }
 0x133   :  { %769 = shalt.err (!%p766_p9)
}
 0x134   :  { %507 = dma.vmem_to_hbm [thread:$0]  %s502_s21, 256, %s973_s3, [#allocation4], %s801_s28, %s801_s28, %s802_s29  }
 0x135   :  { %s770_s11 = scalar_lea.vmem %s869_s23, 256  ;;  %p775_p11 = scmp.lt.s32.totalorder %s869_s23, %s869_s23 }
 0x136   :  { %p771_p10 = scmp.ne.s32.totalorder %s869_s23, %s770_s11  ;;  %p776_p12 = scmp.lt.s32.totalorder %s770_s11, %s770_s11 }
 0x138   :  { %p777_p13 = por %p776_p12, %p775_p11 }
 0x13a   :  { %p778_p0 = pnand %p777_p13, %p771_p10 }
 0x13c   :  { %781 = shalt.err (!%p778_p0)
}
 0x13d   :  { %s782_s14 = scalar_lea.hbm %s975_s5, 256 }
 0x13e   :  { %p783_p1 = scmp.ne.s32.totalorder %s975_s5, %s782_s14  ;;  %p786_p2 = scmp.lt.u32.totalorder %s782_s14, %s975_s5 }
 0x140   :  { %p788_p3 = pnand %p786_p2, %p783_p1 }
 0x142   :  { %791 = shalt.err (!%p788_p3)
}
 0x143   :  { %521 = dma.vmem_to_hbm [thread:$0]  %s869_s23, 256, %s975_s5, [#allocation9], %s801_s28, %s801_s28, %s802_s29   ;;  %vm459_vm0 = vcmask 257024  }
 0x1a0   :  { %v379_v0 = vpop.trf.xlu0 }
 0x1a1   :  { %v588_v1 = vpack.c.bf16 %v379_v0, %v379_v0 }
 0x1a3   :  { %460 = vst.msk [vmem:[%s974_s4] sm:$0xf] %vm459_vm0, %v588_v1 }
 0x1a4   :  { %v380_v2 = vpop.trf.xlu0 }
 0x1a5   :  { %v589_v3 = vpack.c.bf16 %v380_v2, %v380_v2 }
 0x1a7   :  { %461 = vst.msk [vmem:[%s974_s4 + $0x4] sm:$0xf] %vm459_vm0, %v589_v3 }
 0x1a8   :  { %v381_v4 = vpop.trf.xlu0 }
 0x1a9   :  { %v590_v5 = vpack.c.bf16 %v381_v4, %v381_v4 }
 0x1ab   :  { %462 = vst.msk [vmem:[%s974_s4 + $0x8] sm:$0xf] %vm459_vm0, %v590_v5 }
 0x1ac   :  { %v382_v6 = vpop.trf.xlu0 }
 0x1ad   :  { %v591_v7 = vpack.c.bf16 %v382_v6, %v382_v6 }
 0x1af   :  { %463 = vst.msk [vmem:[%s974_s4 + $0xc] sm:$0xf] %vm459_vm0, %v591_v7 }
 0x1b0   :  { %v383_v8 = vpop.trf.xlu0 }
 0x1b1   :  { %v592_v9 = vpack.c.bf16 %v383_v8, %v383_v8 }
 0x1b3   :  { %464 = vst.msk [vmem:[%s974_s4 + $0x10] sm:$0xf] %vm459_vm0, %v592_v9 }
 0x1b4   :  { %v384_v10 = vpop.trf.xlu0 }
 0x1b5   :  { %v593_v11 = vpack.c.bf16 %v384_v10, %v384_v10 }
 0x1b7   :  { %465 = vst.msk [vmem:[%s974_s4 + $0x14] sm:$0xf] %vm459_vm0, %v593_v11 }
 0x1b8   :  { %v385_v12 = vpop.trf.xlu0 }
 0x1b9   :  { %v594_v13 = vpack.c.bf16 %v385_v12, %v385_v12 }
 0x1bb   :  { %466 = vst.msk [vmem:[%s974_s4 + $0x18] sm:$0xf] %vm459_vm0, %v594_v13 }
 0x1bc   :  { %v386_v14 = vpop.trf.xlu0 }
 0x1bd   :  { %v595_v15 = vpack.c.bf16 %v386_v14, %v386_v14 }
 0x1bf   :  { %467 = vst.msk [vmem:[%s974_s4 + $0x1c] sm:$0xf] %vm459_vm0, %v595_v15 }
 0x1c0   :  { %v387_v16 = vpop.trf.xlu0 }
 0x1c1   :  { %v596_v17 = vpack.c.bf16 %v387_v16, %v387_v16 }
 0x1c3   :  { %468 = vst.msk [vmem:[%s974_s4 + $0x20] sm:$0xf] %vm459_vm0, %v596_v17 }
 0x1c4   :  { %v388_v18 = vpop.trf.xlu0 }
 0x1c5   :  { %v597_v19 = vpack.c.bf16 %v388_v18, %v388_v18 }
 0x1c7   :  { %469 = vst.msk [vmem:[%s974_s4 + $0x24] sm:$0xf] %vm459_vm0, %v597_v19 }
 0x1c8   :  { %v389_v20 = vpop.trf.xlu0 }
 0x1c9   :  { %v598_v21 = vpack.c.bf16 %v389_v20, %v389_v20 }
 0x1cb   :  { %470 = vst.msk [vmem:[%s974_s4 + $0x28] sm:$0xf] %vm459_vm0, %v598_v21 }
 0x1cc   :  { %v390_v22 = vpop.trf.xlu0 }
 0x1cd   :  { %v599_v23 = vpack.c.bf16 %v390_v22, %v390_v22 }
 0x1cf   :  { %471 = vst.msk [vmem:[%s974_s4 + $0x2c] sm:$0xf] %vm459_vm0, %v599_v23 }
 0x1d0   :  { %v391_v24 = vpop.trf.xlu0 }
 0x1d1   :  { %v600_v25 = vpack.c.bf16 %v391_v24, %v391_v24 }
 0x1d3   :  { %472 = vst.msk [vmem:[%s974_s4 + $0x30] sm:$0xf] %vm459_vm0, %v600_v25 }
 0x1d4   :  { %v392_v26 = vpop.trf.xlu0 }
 0x1d5   :  { %v601_v27 = vpack.c.bf16 %v392_v26, %v392_v26 }
 0x1d7   :  { %473 = vst.msk [vmem:[%s974_s4 + $0x34] sm:$0xf] %vm459_vm0, %v601_v27 }
 0x1d8   :  { %v393_v28 = vpop.trf.xlu0 }
 0x1d9   :  { %v602_v29 = vpack.c.bf16 %v393_v28, %v393_v28 }
 0x1db   :  { %474 = vst.msk [vmem:[%s974_s4 + $0x38] sm:$0xf] %vm459_vm0, %v602_v29 }
 0x1dc   :  { %v394_v30 = vpop.trf.xlu0 }
 0x1dd   :  { %v603_v31 = vpack.c.bf16 %v394_v30, %v394_v30 }
 0x1df   :  { %475 = vst.msk [vmem:[%s974_s4 + $0x3c] sm:$0xf] %vm459_vm0, %v603_v31 }
 0x1e0   :  { %796 = dma.done.wait [#allocation4], 256  }
 0x1e1   :  { %797 = vsyncadd [#allocation4], 4294967040 }
 0x1e2   :  { %798 = dma.done.wait [#allocation9], 256  }
 0x1e3   :  { %799 = vsyncadd [#allocation9], 4294967040 }
 0x1e4   :  { %530 = vsyncpa [#allocation3], 1 }
 0x1e5   :  { %531 = vsyncpa [#allocation6], 1 }
 0x1e6   :  { %532 = vsyncpa [#allocation4], 1 }
 0x1e7   :  { %533 = vsyncpa [#allocation9], 1 }

</bundles_post_ra>
